<compile_context>
chip_gen: v7x
topology: tpu7x:2x2x1
jax: 0.10.0
libtpu: 0.0.40
codegen_flags: <defaults>
</compile_context>

<pallas_src>
import functools

import jax
import jax.numpy as jnp
from jax.experimental import pallas as pl
from jax.experimental.pallas import tpu as pltpu


# ------------------------------- helpers ------------------------------------

def _round_up(n, m):
    return ((n + m - 1) // m) * m


def _pad2d(a, rows, cols):
    pr, pc = rows - a.shape[0], cols - a.shape[1]
    if pr == 0 and pc == 0:
        return a
    return jnp.pad(a, ((0, pr), (0, pc)))


def _sublane_multiple(dtype):
    # sub-32-bit dtypes pack rows along sublanes: 8 (f32) / 16 (bf16) / 32 (i8)
    return {4: 8, 2: 16, 1: 32}.get(jnp.dtype(dtype).itemsize, 8)


def _pick_batch_tile(B, sub, per_row_bytes, resident_bytes, budget_bytes):
    """Batch tile (multiple of `sub`) balancing VMEM budget, batch-padding
    waste (<=15%), and >=2 grid steps for megacore sharding on large batches."""
    b_min = _round_up(B, sub)
    vmem_rows = (budget_bytes - resident_bytes) // max(per_row_bytes, 1)
    cap = max(sub, min(1024, (vmem_rows // sub) * sub))
    if b_min <= cap and b_min <= 256:
        return b_min                       # tiny batch: one tile, grid=(1,)
    prefer_multi = b_min > 256
    best_tm, best_key = sub, None
    for tm in range(sub, cap + 1, sub):
        b_pad = _round_up(B, tm)
        waste = (b_pad - B) / max(B, 1)
        steps = b_pad // tm
        key = (waste <= 0.15, steps >= 2 or not prefer_multi, tm)
        if best_key is None or key > best_key:
            best_key, best_tm = key, tm
    return best_tm


# ----------------------------- fused kernel ---------------------------------

def _fused_seq_kernel(*refs, ops):
    """refs = (x_ref, <w, b per linear>, o_ref); `ops` is a static tuple such
    as ("linear", "relu", "linear", "tanh").  The whole chain runs on one
    VMEM-resident batch tile; intermediates never touch HBM."""
    x_ref, o_ref = refs[0], refs[-1]
    param_refs = refs[1:-1]

    h = x_ref[...]                          # keep the input dtype (no upcast)
    pi = 0
    for op in ops:
        if op == "linear":
            w_ref, b_ref = param_refs[pi], param_refs[pi + 1]
            pi += 2
            lhs = h if h.dtype == w_ref.dtype else h.astype(w_ref.dtype)
            # bf16 x bf16 -> f32 acc is the native MXU fast path; bias in f32.
            h = jnp.dot(lhs, w_ref[...], preferred_element_type=jnp.float32)
            h = h + b_ref[...]
        elif op == "relu":
            h = jnp.maximum(h, 0.0)         # VPU epilogue (free under MXU)
        elif op == "tanh":
            h = jnp.tanh(h)                 # EUP epilogue (free slot)
        else:
            raise ValueError(op)
    o_ref[...] = h.astype(o_ref.dtype)


@functools.partial(jax.jit, static_argnames=("kinds",))
def _fused_forward(x, params, *, kinds):
    """Run a static chain of ('linear', d_in, d_out) / ('relu',) / ('tanh',)
    ops as ONE pallas_call.  `params` are the pre-padded weights/biases in
    chain order.  x: [B, D_in]."""
    B, d_in = x.shape
    out_dtype = x.dtype
    x_isize = jnp.dtype(x.dtype).itemsize
    sub = _sublane_multiple(x.dtype)

    d_in_pad = _round_up(d_in, 128)

    # Walk the static op chain: padded widths, logical cost, intermediate size.
    kind_names = []
    d_cur, d_cur_pad = d_in, d_in_pad
    flops = 0
    transcendentals = 0
    logical_param_bytes = 0
    inter_f32_bytes = 0
    pi = 0
    for op in kinds:
        kind_names.append(op[0])
        if op[0] == "linear":
            _, di, do = op
            assert di == d_cur, (di, d_cur)
            w_p = params[pi]
            do_pad = _round_up(do, 128)
            assert w_p.shape == (d_cur_pad, do_pad), (w_p.shape, d_cur_pad, do_pad)
            flops += 2 * B * di * do
            logical_param_bytes += di * do * w_p.dtype.itemsize + do * 4
            d_cur, d_cur_pad = do, do_pad
            inter_f32_bytes += 4 * d_cur_pad
            pi += 2
        elif op[0] == "tanh":
            transcendentals += B * d_cur
        elif op[0] == "relu":
            pass
        else:
            raise ValueError(op)
    d_out, d_out_pad = d_cur, d_cur_pad
    out_isize = jnp.dtype(out_dtype).itemsize

    # VMEM plan: weights are grid-invariant but double-buffered by the default
    # pipeline (2x); x/out tiles are double-buffered; intermediates are f32.
    resident_bytes = 2 * sum(int(p.size) * p.dtype.itemsize for p in params)
    per_row_bytes = (2 * d_in_pad * x_isize
                     + 2 * d_out_pad * out_isize
                     + inter_f32_bytes)
    budget_bytes = 24 * (1 << 20)           # generation-safe target
    tm = _pick_batch_tile(B, sub, per_row_bytes, resident_bytes, budget_bytes)
    b_pad = _round_up(B, tm)

    x_p = _pad2d(x, b_pad, d_in_pad)        # fuses under jit

    in_specs = [pl.BlockSpec((tm, d_in_pad), lambda i: (i, 0))]
    for p in params:
        # Grid-invariant: block index never changes -> DMA'd once.
        in_specs.append(pl.BlockSpec(p.shape, lambda i: (0, 0)))
    out_specs = pl.BlockSpec((tm, d_out_pad), lambda i: (i, 0))

    est_vmem = resident_bytes + tm * per_row_bytes
    vmem_limit = int(min(max(2 * est_vmem, 32 << 20), 48 << 20))

    # Advisory cost: logical (unpadded) work only.
    bytes_accessed = (B * d_in * x_isize
                      + logical_param_bytes
                      + B * d_out * out_isize)

    out_p = pl.pallas_call(
        functools.partial(_fused_seq_kernel, ops=tuple(kind_names)),
        out_shape=jax.ShapeDtypeStruct((b_pad, d_out_pad), out_dtype),
        grid=(b_pad // tm,),
        in_specs=in_specs,
        out_specs=out_specs,
        compiler_params=pltpu.CompilerParams(
            # batch axis is independent -> megacore sharding on v7x, harmless
            # on single-TC v5e/v6e.
            dimension_semantics=("parallel",),
            vmem_limit_bytes=vmem_limit,
        ),
        cost_estimate=pl.CostEstimate(
            flops=flops,
            transcendentals=transcendentals,
            bytes_accessed=bytes_accessed,
        ),
    )(x_p, *params)

    return out_p[:B, :d_out]


# ------------------------- mini-framework mirrors ----------------------------

class Module:
    def forward(self, *inputt):
        raise NotImplementedError

    def backward(self, *gradwrtoutput):
        raise NotImplementedError

    def param(self):
        return []


class Linear(Module):
    def __init__(self, w, b):
        self.w = jnp.asarray(w)
        self.b = jnp.asarray(b)
        d_in, d_out = self.w.shape
        # Pre-pad ONCE (lane-dense 128 multiples); never re-padded per forward.
        # Weight keeps its own dtype (bf16 weights => bf16 MXU fast path);
        # bias is kept in f32 for the accumulate/epilogue.
        self._w_pad = _pad2d(self.w, _round_up(d_in, 128), _round_up(d_out, 128))
        self._b_pad = _pad2d(self.b.reshape(1, d_out).astype(jnp.float32),
                             1, _round_up(d_out, 128))

    def _op(self):
        return ("linear", int(self.w.shape[0]), int(self.w.shape[1])), \
               (self._w_pad, self._b_pad)

    def forward(self, x):
        spec, params = self._op()
        return _fused_forward(x, params, kinds=(spec,))

    def param(self):
        return [self.w, self.b]


class ReLU(Module):
    def _op(self):
        return ("relu",), ()

    def forward(self, x):
        return _fused_forward(x, (), kinds=(("relu",),))


class Tanh(Module):
    def _op(self):
        return ("tanh",), ()

    def forward(self, x):
        return _fused_forward(x, (), kinds=(("tanh",),))


class Sequential(Module):
    """Mirrors the reference Sequential.forward (chain of layer.forward); when
    every layer exposes a fusable op descriptor the whole chain runs as ONE
    Pallas kernel with VMEM-resident intermediates."""

    def __init__(self, structure):
        self.structure = structure

    def forward(self, x):
        if self.structure and all(hasattr(l, "_op") for l in self.structure):
            specs, params = [], []
            for layer in self.structure:
                s, p = layer._op()
                specs.append(s)
                params.extend(p)
            return _fused_forward(x, tuple(params), kinds=tuple(specs))
        # Fallback: semantic reference behaviour (per-layer chaining).
        for layer in self.structure:
            x = layer.forward(x)
        return x

    # TODO(synk): backward() (reverse-order gradient chain) not implemented —
    # only the forward pass is required here.

    def param(self):
        return [layer.param() for _, layer in enumerate(self.structure)]


# ---------------------------------- main -------------------------------------

if __name__ == "__main__":
    key = jax.random.PRNGKey(0)
    k_x, k_w1, k_b1, k_w2, k_b2 = jax.random.split(key, 5)

    B, D_in, D_hid, D_out = 8, 32, 64, 16

    x = jax.random.normal(k_x, (B, D_in), dtype=jnp.float32)
    w1 = jax.random.normal(k_w1, (D_in, D_hid), dtype=jnp.float32) * 0.1
    b1 = jax.random.normal(k_b1, (D_hid,), dtype=jnp.float32) * 0.1
    w2 = jax.random.normal(k_w2, (D_hid, D_out), dtype=jnp.float32) * 0.1
    b2 = jax.random.normal(k_b2, (D_out,), dtype=jnp.float32) * 0.1

    model = Sequential([Linear(w1, b1), ReLU(), Linear(w2, b2), Tanh()])

    # Fused path: whole Linear->ReLU->Linear->Tanh chain in one pallas_call.
    out = jax.block_until_ready(model.forward(x))

    # Reference check in plain JAX (same math).
    ref = jnp.tanh(jnp.maximum(x @ w1 + b1, 0.0) @ w2 + b2)
    assert out.shape == (B, D_out)
    assert jnp.allclose(out, ref, atol=1e-5, rtol=1e-5)

    # Per-layer fallback path (each layer = one kernel): semantics match the
    # reference chaining exactly.
    out_chain = x
    for layer in model.structure:
        out_chain = layer.forward(out_chain)
    out_chain = jax.block_until_ready(out_chain)
    assert jnp.allclose(out_chain, ref, atol=1e-5, rtol=1e-5)

    # bf16 path: bf16 activations x bf16 weights with f32 accumulation
    # (native MXU fast path), dtype-aware 16-row sublane tiling.
    model_bf16 = Sequential([Linear(w1.astype(jnp.bfloat16), b1), ReLU(),
                             Linear(w2.astype(jnp.bfloat16), b2), Tanh()])
    out_bf16 = jax.block_until_ready(model_bf16.forward(x.astype(jnp.bfloat16)))
    assert out_bf16.dtype == jnp.bfloat16
    assert jnp.allclose(out_bf16.astype(jnp.float32), ref, atol=6e-2)

    print("KERNEL_OK")
</pallas_src>

<mosaic_0001>
module attributes {stable_mosaic.version = 11 : i64} {
  func.func @_fused_seq_kernel(%arg0: i32, %arg1: memref<8x128xf32, #tpu.memory_space<vmem>>, %arg2: memref<128x128xf32, #tpu.memory_space<vmem>>, %arg3: memref<1x128xf32, #tpu.memory_space<vmem>>, %arg4: memref<128x128xf32, #tpu.memory_space<vmem>>, %arg5: memref<1x128xf32, #tpu.memory_space<vmem>>, %arg6: memref<8x128xf32, #tpu.memory_space<vmem>>) attributes {dimension_semantics = [#tpu.dimension_semantics<parallel>], iteration_bounds = array<i64: 1>, scalar_prefetch = 0 : i64, scratch_operands = 0 : i64, tpu.core_type = #tpu.core_type<tc>, window_params = [{transform_indices = @transform_0, window_bounds = array<i64: 8, 128>}, {pipeline_mode = #tpu.pipeline_mode<synchronous>, transform_indices = @transform_1, window_bounds = array<i64: 128, 128>}, {pipeline_mode = #tpu.pipeline_mode<synchronous>, transform_indices = @transform_2, window_bounds = array<i64: 1, 128>}, {pipeline_mode = #tpu.pipeline_mode<synchronous>, transform_indices = @transform_3, window_bounds = array<i64: 128, 128>}, {pipeline_mode = #tpu.pipeline_mode<synchronous>, transform_indices = @transform_4, window_bounds = array<i64: 1, 128>}, {transform_indices = @transform_5, window_bounds = array<i64: 8, 128>}]} {
    %c0 = arith.constant 0 : index
    %c0_0 = arith.constant 0 : index
    %0 = vector.load %arg1[%c0, %c0_0] : memref<8x128xf32, #tpu.memory_space<vmem>>, vector<8x128xf32>
    %c0_1 = arith.constant 0 : index
    %c0_2 = arith.constant 0 : index
    %1 = vector.load %arg2[%c0_1, %c0_2] : memref<128x128xf32, #tpu.memory_space<vmem>>, vector<128x128xf32>
    %cst = arith.constant dense<0.000000e+00> : vector<8x128xf32>
    %2 = tpu.matmul %0, %1, %cst {dimension_numbers = #tpu.dot_dimension_numbers<[1], [0], [0], [1], [0, 0, 1, 1], [], []>} : vector<8x128xf32>, vector<128x128xf32>, vector<8x128xf32> -> vector<8x128xf32>
    %c0_3 = arith.constant 0 : index
    %c0_4 = arith.constant 0 : index
    %3 = vector.load %arg3[%c0_3, %c0_4] : memref<1x128xf32, #tpu.memory_space<vmem>>, vector<1x128xf32>
    %4 = vector.broadcast %3 : vector<1x128xf32> to vector<8x128xf32>
    %5 = arith.addf %2, %4 : vector<8x128xf32>
    %cst_5 = arith.constant 0.000000e+00 : f32
    %6 = vector.broadcast %cst_5 : f32 to vector<8x128xf32>
    %7 = arith.maximumf %5, %6 : vector<8x128xf32>
    %c0_6 = arith.constant 0 : index
    %c0_7 = arith.constant 0 : index
    %8 = vector.load %arg4[%c0_6, %c0_7] : memref<128x128xf32, #tpu.memory_space<vmem>>, vector<128x128xf32>
    %cst_8 = arith.constant dense<0.000000e+00> : vector<8x128xf32>
    %9 = tpu.matmul %7, %8, %cst_8 {dimension_numbers = #tpu.dot_dimension_numbers<[1], [0], [0], [1], [0, 0, 1, 1], [], []>} : vector<8x128xf32>, vector<128x128xf32>, vector<8x128xf32> -> vector<8x128xf32>
    %c0_9 = arith.constant 0 : index
    %c0_10 = arith.constant 0 : index
    %10 = vector.load %arg5[%c0_9, %c0_10] : memref<1x128xf32, #tpu.memory_space<vmem>>, vector<1x128xf32>
    %11 = vector.broadcast %10 : vector<1x128xf32> to vector<8x128xf32>
    %12 = arith.addf %9, %11 : vector<8x128xf32>
    %13 = math.tanh %12 : vector<8x128xf32>
    %c0_11 = arith.constant 0 : index
    %c0_12 = arith.constant 0 : index
    %14 = vector.load %arg6[%c0_11, %c0_12] : memref<8x128xf32, #tpu.memory_space<vmem>>, vector<8x128xf32>
    tpu.vector_store %arg6[%c0_11, %c0_12], %13 {strides = array<i32>} : memref<8x128xf32, #tpu.memory_space<vmem>>, vector<8x128xf32>,
    return
  }
  func.func @transform_0(%arg0: i32) -> (i32, i32) {
    %c0_i32 = arith.constant 0 : i32
    %c0_i32_0 = arith.constant 0 : i32
    return %arg0, %c0_i32 : i32, i32
  }
  func.func @transform_1(%arg0: i32) -> (i32, i32) {
    %c0_i32 = arith.constant 0 : i32
    %c0_i32_0 = arith.constant 0 : i32
    %c0_i32_1 = arith.constant 0 : i32
    return %c0_i32, %c0_i32_0 : i32, i32
  }
  func.func @transform_2(%arg0: i32) -> (i32, i32) {
    %c0_i32 = arith.constant 0 : i32
    %c0_i32_0 = arith.constant 0 : i32
    %c0_i32_1 = arith.constant 0 : i32
    return %c0_i32, %c0_i32_0 : i32, i32
  }
  func.func @transform_3(%arg0: i32) -> (i32, i32) {
    %c0_i32 = arith.constant 0 : i32
    %c0_i32_0 = arith.constant 0 : i32
    %c0_i32_1 = arith.constant 0 : i32
    return %c0_i32, %c0_i32_0 : i32, i32
  }
  func.func @transform_4(%arg0: i32) -> (i32, i32) {
    %c0_i32 = arith.constant 0 : i32
    %c0_i32_0 = arith.constant 0 : i32
    %c0_i32_1 = arith.constant 0 : i32
    return %c0_i32, %c0_i32_0 : i32, i32
  }
  func.func @transform_5(%arg0: i32) -> (i32, i32) {
    %c0_i32 = arith.constant 0 : i32
    %c0_i32_0 = arith.constant 0 : i32
    return %arg0, %c0_i32 : i32, i32
  }
}

</mosaic_0001>

<bundles_post_ra>
// kernel: _fused_forward.1
= control target key start
LH: loop header
LB: loop body
LE: loop exit
PB: predicated region body
PF: predicated region fallthrough
CT: control target
= control target key end

     0   :  { %10 = vsyncpa [#allocation3], 0  ;;  %s590_s0 = inlined_call_operand.vmem [shape: f32[8,128], index: 0, kind: input, shape index: {}]   ;;  %s591_s1 = inlined_call_operand.hbm [shape: f32[128,128], index: 1, kind: input, shape index: {}]   ;;  %s592_s2 = inlined_call_operand.vmem [shape: f32[1,128], index: 2, kind: input, shape index: {}]   ;;  %s593_s3 = inlined_call_operand.hbm [shape: f32[128,128], index: 3, kind: input, shape index: {}]   ;;  %s594_s4 = inlined_call_operand.vmem [shape: f32[1,128], index: 4, kind: input, shape index: {}]   ;;  %s595_s5 = inlined_call_operand.hbm [shape: f32[8,128], index: 5, kind: output, shape index: {}]  }
   0x1   :  { %11 = vsyncpa [#allocation6], 0 }
   0x2   :  { %12 = vsyncpa [#allocation4], 0  ;;  %s491_s18 = smov [#allocation2]   ;;  %s419_s22 = scalar_lea.hbm %s591_s1, 2048 }
   0x3   :  { %s20_s19 = sshll.u32 %s491_s18, 4  ;;  %p420_p0 = scmp.ne.s32.totalorder %s591_s1, %s419_s22  ;;  %s21_s19 = int_to_ptr.vmem [resolvable:$true] %s20_s19 }
   0x4   :  { %p423_p1 = scmp.lt.u32.totalorder %s419_s22, %s591_s1 }
   0x6   :  { %p425_p2 = pnand %p423_p1, %p420_p0 }
   0x8   :  { %428 = shalt.err (!%p425_p2)
}
   0x9   :  { %s429_s27 = scalar_lea.vmem %s21_s19, 2048  ;;  %p434_p4 = scmp.lt.s32.totalorder %s21_s19, %s21_s19 }
   0xa   :  { %p430_p3 = scmp.ne.s32.totalorder %s21_s19, %s429_s27  ;;  %p435_p5 = scmp.lt.s32.totalorder %s429_s27, %s429_s27 }
   0xc   :  { %p436_p6 = por %p435_p5, %p434_p4 }
   0xe   :  { %p437_p7 = pnand %p436_p6, %p430_p3 }
  0x10   :  { %440 = shalt.err (!%p437_p7)
}
  0x11   :  { %s492_s28 = smov 128   ;;  %s493_s29 = smov 8  }
  0x12   :  { %26 = dma.hbm_to_vmem [thread:$0]  %s591_s1, 2048, %s21_s19, [#allocation3], %s492_s28, %s492_s28, %s493_s29  }
  0x13   :  { %s494_s7 = smov [#allocation5]   ;;  %s441_s11 = scalar_lea.hbm %s593_s3, 2048 }
  0x14   :  { %s34_s8 = sshll.u32 %s494_s7, 4  ;;  %p442_p8 = scmp.ne.s32.totalorder %s593_s3, %s441_s11  ;;  %s35_s8 = int_to_ptr.vmem [resolvable:$true] %s34_s8 }
  0x15   :  { %p445_p9 = scmp.lt.u32.totalorder %s441_s11, %s593_s3 }
  0x17   :  { %p447_p10 = pnand %p445_p9, %p442_p8 }
  0x19   :  { %450 = shalt.err (!%p447_p10)
}
  0x1a   :  { %s451_s16 = scalar_lea.vmem %s35_s8, 2048  ;;  %p456_p12 = scmp.lt.s32.totalorder %s35_s8, %s35_s8 }
  0x1b   :  { %p452_p11 = scmp.ne.s32.totalorder %s35_s8, %s451_s16  ;;  %p457_p13 = scmp.lt.s32.totalorder %s451_s16, %s451_s16 }
  0x1d   :  { %p458_p0 = por %p457_p13, %p456_p12 }
  0x1f   :  { %p459_p1 = pnand %p458_p0, %p452_p11 }
  0x21   :  { %462 = shalt.err (!%p459_p1)
}
  0x22   :  { %40 = dma.hbm_to_vmem [thread:$0]  %s593_s3, 2048, %s35_s8, [#allocation6], %s492_s28, %s492_s28, %s493_s29  }
  0x23   :  { %485 = dma.done.wait [#allocation3], 2048  }
  0x24   :  { %486 = vsyncadd [#allocation3], 4294965248 }
  0x25   :  { %487 = dma.done.wait [#allocation6], 2048  }
  0x26   :  { %488 = vsyncadd [#allocation6], 4294965248  ;;  %v495_v0 = vmov 0.0|0.0   ;;  %vm496_vm0 = vmmov 0   ;;  %v497_v1 = vmov 0.0   ;;  %v50_v2 = vld [vmem:[#allocation2] sm:$0xff] }
  0x27   :  { %361 = vmatprep.subr.bf16.mxu0 %v495_v0  ;;  %323 = vmatprep.mubr.msk.f32.mxu0 %vm496_vm0, %v497_v1  ;;  %v51_v3 = vld [vmem:[#allocation2 + $0x8] sm:$0xff]  ;;  %v52_v4 = vld [vmem:[#allocation2 + $0x10] sm:$0xff]  ;;  %v53_v6 = vld [vmem:[#allocation2 + $0x18] sm:$0xff] }
  0x28   :  { %385 = vmatprep.subr.bf16.mxu1 %v495_v0  ;;  %358 = vmatprep.mubr.msk.f32.mxu1 %vm496_vm0, %v497_v1  ;;  %v362_v5 = vpack.c.bf16 %v51_v3, %v50_v2  ;;  %v365_v7 = vpack.c.bf16 %v53_v6, %v52_v4  ;;  %v54_v8 = vld [vmem:[#allocation2 + $0x20] sm:$0xff]  ;;  %v55_v9 = vld [vmem:[#allocation2 + $0x28] sm:$0xff]  ;;  %v146_v12 = vld [vmem:[#allocation5 + $0x10] sm:$0xff] }
  0x29   :  { %v144_v10 = vld [vmem:[#allocation5] sm:$0xff]  ;;  %v145_v11 = vld [vmem:[#allocation5 + $0x8] sm:$0xff]  ;;  %v147_v13 = vld [vmem:[#allocation5 + $0x18] sm:$0xff]  ;;  %v368_v14 = vpack.c.bf16 %v55_v9, %v54_v8 }
  0x2a   :  { %363 = vmatpush3.bf16.msra.mxu0 %v362_v5  ;;  %v386_v15 = vpack.c.bf16 %v145_v11, %v144_v10  ;;  %v56_v16 = vld [vmem:[#allocation2 + $0x30] sm:$0xff]  ;;  %v57_v17 = vld [vmem:[#allocation2 + $0x38] sm:$0xff]  ;;  %v389_v18 = vpack.c.bf16 %v147_v13, %v146_v12  ;;  %v148_v19 = vld [vmem:[#allocation5 + $0x20] sm:$0xff] }
  0x2b   :  { %364 = vmatprep.subr.bf16.mxu0 %v495_v0  ;;  %v149_v20 = vld [vmem:[#allocation5 + $0x28] sm:$0xff]  ;;  %v371_v21 = vpack.c.bf16 %v57_v17, %v56_v16  ;;  %v58_v22 = vld [vmem:[#allocation2 + $0x40] sm:$0xff]  ;;  %v150_v25 = vld [vmem:[#allocation5 + $0x30] sm:$0xff] }
  0x2c   :  { %387 = vmatpush3.bf16.msra.mxu1 %v386_v15  ;;  %v59_v23 = vld [vmem:[#allocation2 + $0x48] sm:$0xff]  ;;  %v392_v24 = vpack.c.bf16 %v149_v20, %v148_v19  ;;  %v151_v26 = vld [vmem:[#allocation5 + $0x38] sm:$0xff]  ;;  %v60_v28 = vld [vmem:[#allocation2 + $0x50] sm:$0xff] }
  0x2d   :  { %388 = vmatprep.subr.bf16.mxu1 %v495_v0  ;;  %v374_v27 = vpack.c.bf16 %v59_v23, %v58_v22  ;;  %v61_v29 = vld [vmem:[#allocation2 + $0x58] sm:$0xff]  ;;  %v395_v30 = vpack.c.bf16 %v151_v26, %v150_v25  ;;  %v152_v31 = vld [vmem:[#allocation5 + $0x40] sm:$0xff]  ;;  %v153_v32 = vld [vmem:[#allocation5 + $0x48] sm:$0xff] }
  0x2e   :  { %366 = vmatpush3.bf16.msra.mxu0 %v365_v7  ;;  %v377_v33 = vpack.c.bf16 %v61_v29, %v60_v28  ;;  %v62_v34 = vld [vmem:[#allocation2 + $0x60] sm:$0xff]  ;;  %v63_v35 = vld [vmem:[#allocation2 + $0x68] sm:$0xff]  ;;  %v398_v36 = vpack.c.bf16 %v153_v32, %v152_v31  ;;  %v154_v37 = vld [vmem:[#allocation5 + $0x50] sm:$0xff] }
  0x2f   :  { %367 = vmatprep.subr.bf16.mxu0 %v495_v0  ;;  %v155_v38 = vld [vmem:[#allocation5 + $0x58] sm:$0xff]  ;;  %v380_v39 = vpack.c.bf16 %v63_v35, %v62_v34  ;;  %v64_v40 = vld [vmem:[#allocation2 + $0x70] sm:$0xff]  ;;  %v156_v43 = vld [vmem:[#allocation5 + $0x60] sm:$0xff] }
  0x30   :  { %390 = vmatpush3.bf16.msra.mxu1 %v389_v18  ;;  %v65_v41 = vld [vmem:[#allocation2 + $0x78] sm:$0xff]  ;;  %v401_v42 = vpack.c.bf16 %v155_v38, %v154_v37  ;;  %v157_v44 = vld [vmem:[#allocation5 + $0x68] sm:$0xff]  ;;  %v158_v48 = vld [vmem:[#allocation5 + $0x70] sm:$0xff] }
  0x31   :  { %391 = vmatprep.subr.bf16.mxu1 %v495_v0  ;;  %v383_v45 = vpack.c.bf16 %v65_v41, %v64_v40  ;;  %v404_v46 = vpack.c.bf16 %v157_v44, %v156_v43  ;;  %v49_v47 = vld [vmem:[%s590_s0] sm:$0xff]  ;;  %s498_s0 = smov [#allocation7]  }
  0x32   :  { %369 = vmatpush3.bf16.msra.mxu0 %v368_v14  ;;  %v159_v49 = vld [vmem:[#allocation5 + $0x78] sm:$0xff]  ;;  %s245_s23 = sshll.u32 %s498_s0, 4  ;;  %s246_s23 = int_to_ptr.vmem [resolvable:$true] %s245_s23 }
  0x33   :  { %370 = vmatprep.subr.bf16.mxu0 %v495_v0  ;;  %v407_v50 = vpack.c.bf16 %v159_v49, %v158_v48  ;;  %v255_v51 = vld [vmem:[%s592_s2] ss:$0 sm:$0xff]  ;;  %s463_s24 = scalar_lea.vmem %s246_s23, 128  ;;  %p468_p3 = scmp.lt.s32.totalorder %s246_s23, %s246_s23 }
  0x34   :  { %393 = vmatpush3.bf16.msra.mxu1 %v392_v24  ;;  %v256_v56 = vld [vmem:[%s594_s4] ss:$0 sm:$0xff]  ;;  %p464_p2 = scmp.ne.s32.totalorder %s246_s23, %s463_s24  ;;  %p469_p4 = scmp.lt.s32.totalorder %s463_s24, %s463_s24 }
  0x35   :  { %394 = vmatprep.subr.bf16.mxu1 %v495_v0 }
  0x36   :  { %372 = vmatpush3.bf16.msra.mxu0 %v371_v21  ;;  %p470_p5 = por %p469_p4, %p468_p3 }
  0x37   :  { %373 = vmatprep.subr.bf16.mxu0 %v495_v0 }
  0x38   :  { %396 = vmatpush3.bf16.msra.mxu1 %v395_v30  ;;  %p471_p6 = pnand %p470_p5, %p464_p2 }
  0x39   :  { %397 = vmatprep.subr.bf16.mxu1 %v495_v0 }
  0x3a   :  { %375 = vmatpush3.bf16.msra.mxu0 %v374_v27 }
  0x3b   :  { %376 = vmatprep.subr.bf16.mxu0 %v495_v0 }
  0x3c   :  { %399 = vmatpush3.bf16.msra.mxu1 %v398_v36 }
  0x3d   :  { %400 = vmatprep.subr.bf16.mxu1 %v495_v0 }
  0x3e   :  { %378 = vmatpush3.bf16.msra.mxu0 %v377_v33 }
  0x3f   :  { %379 = vmatprep.subr.bf16.mxu0 %v495_v0 }
  0x40   :  { %402 = vmatpush3.bf16.msra.mxu1 %v401_v42 }
  0x41   :  { %403 = vmatprep.subr.bf16.mxu1 %v495_v0 }
  0x42   :  { %381 = vmatpush3.bf16.msra.mxu0 %v380_v39 }
  0x43   :  { %382 = vmatprep.subr.bf16.mxu0 %v495_v0 }
  0x44   :  { %405 = vmatpush3.bf16.msra.mxu1 %v404_v46 }
  0x45   :  { %406 = vmatprep.subr.bf16.mxu1 %v495_v0 }
  0x46   :  { %384 = vmatpush3.bf16.msra.mxu0 %v383_v45 }
  0x48   :  { %408 = vmatpush3.bf16.msra.mxu1 %v407_v50 }
  0x49   :  { %324 = vmatmul.mubr.f32.vlgmr.msra.gmra.mrb[0].mxu0 %v49_v47 }
 0x11c   :  { %v139_v52 = vpop.f32.mrb[0].mxu0 }
 0x11d   :  { %v140_v53 = vadd.f32 %v255_v51, %v139_v52  ;;  %v325_v54 = vpop.f32.mrb[1].mxu0 }
 0x11f   :  { %v143_v55 = vmax.f32 %v140_v53, 0.0 }
 0x121   :  { %359 = vmatmul.mubr.f32.vlgmr.msra.gmra.mrb[0].mxu1 %v143_v55 }
 0x1f4   :  { %v233_v57 = vpop.f32.mrb[0].mxu1 }
 0x1f5   :  { %v234_v58 = vadd.f32 %v256_v56, %v233_v57  ;;  %v360_v59 = vpop.f32.mrb[1].mxu1 }
 0x1f7   :  { %417 = vtanh.f32 %v234_v58 }
 0x201   :  { %v418_v60 = vpop.eup %417 }
 0x202   :  { %238 = vst [vmem:[#allocation7] sm:$0xff] %v418_v60 }
 0x203   :  { %474 = shalt.err (!%p471_p6)
}
 0x204   :  { %s475_s4 = scalar_lea.hbm %s595_s5, 128 }
 0x205   :  { %p476_p7 = scmp.ne.s32.totalorder %s595_s5, %s475_s4  ;;  %p479_p8 = scmp.lt.u32.totalorder %s475_s4, %s595_s5 }
 0x207   :  { %p481_p9 = pnand %p479_p8, %p476_p7 }
 0x209   :  { %484 = shalt.err (!%p481_p9)
}
 0x20a   :  { %248 = dma.vmem_to_hbm [thread:$0]  %s246_s23, 128, %s595_s5, [#allocation4]  }
 0x20b   :  { %489 = dma.done.wait [#allocation4], 128  }
 0x20c   :  { %490 = vsyncadd [#allocation4], 4294967168 }
 0x20d   :  { %252 = vsyncpa [#allocation3], 1 }
 0x20e   :  { %253 = vsyncpa [#allocation6], 1 }
 0x20f   :  { %254 = vsyncpa [#allocation4], 1 }

</bundles_post_ra>
